<compile_context>
chip_gen: v5e
topology: v5e:2x2
jax: 0.10.0
libtpu: 0.0.40
codegen_flags: <defaults>
</compile_context>

<pallas_src>
import functools
import math

import jax
import jax.numpy as jnp
from jax import lax
from jax.experimental import pallas as pl
from jax.experimental.pallas import tpu as pltpu

_LANE = 128
_TARGET_BLOCK_BYTES = 8 * 1024 * 1024    # per input block (double-buffered by Pallas)
_MAX_ROW_TILE = 1024                     # sublane extent cap
_MAX_LANE_TILE = 8192                    # lane extent cap (64 unrolled 128-chunks)
_MIN_SPLIT_BLOCK_BYTES = 1024 * 1024     # only split rows for megacore if blocks stay >= 1 MiB
_MIN_PALLAS_BYTES = 4 * 1024 * 1024      # below this, plain jnp.max is faster


def _cdiv(a, b):
    return -(-a // b)


def _round_up(x, m):
    return ((x + m - 1) // m) * m


def _sublane_base(itemsize):
    # dtype-aware minimum sublane tile: 8 for 4-byte, 16 for 2-byte, 32 for 1-byte.
    return max(8, 32 // max(1, itemsize))


def _min_value(dtype):
    dtype = jnp.dtype(dtype)
    if jnp.issubdtype(dtype, jnp.floating):
        return float("-inf")
    return int(jnp.iinfo(dtype).min)


def _pick_tiles(rows, cols, itemsize):
    base = _sublane_base(itemsize)
    l_tile = min(_round_up(cols, _LANE), _MAX_LANE_TILE)

    r_by_bytes = max(base, (_TARGET_BLOCK_BYTES // (l_tile * itemsize)) // base * base)
    r_tile = min(_round_up(rows, base), _MAX_ROW_TILE, r_by_bytes)

    # v7x megacore: ensure >=2 programs on the "parallel" rows axis when the
    # resulting blocks stay large enough to amortize the ~0.35us per-step cost.
    if _cdiv(rows, r_tile) < 2 and rows > base:
        r_half = _round_up(_cdiv(rows, 2), base)
        if r_half * l_tile * itemsize >= _MIN_SPLIT_BLOCK_BYTES:
            r_tile = r_half

    return r_tile, l_tile


def _global_max_kernel(x_ref, o_ref, acc_ref, *, n_chunks, l_tile, cols,
                       need_mask, minval):
    # x_ref block: (r_tile, l_tile); acc_ref scratch: (r_tile, 128) lane-dense
    # accumulator; o_ref block: (r_tile, 1), written only on the last col block.
    l = pl.program_id(1)
    r_tile = acc_ref.shape[0]

    if need_mask:
        lane = lax.broadcasted_iota(jnp.int32, (r_tile, _LANE), 1)
        col0 = l * l_tile

    def chunk(c):
        v = x_ref[:, c * _LANE:(c + 1) * _LANE]            # lane-aligned slice (vreg select)
        if need_mask:
            v = jnp.where(col0 + c * _LANE + lane < cols, v, minval)
        return v

    # VPU-only fold of the block into a (r_tile, 128) partial (no XLU per step).
    part = chunk(0)
    for c in range(1, n_chunks):
        part = jnp.maximum(part, chunk(c))

    @pl.when(l == 0)
    def _init():
        acc_ref[...] = part

    @pl.when(l > 0)
    def _accumulate():
        acc_ref[...] = jnp.maximum(acc_ref[...], part)

    @pl.when(l == pl.num_programs(1) - 1)
    def _finalize():
        # Single cross-lane reduce + single (r_tile, 1) store per row block.
        o_ref[...] = jnp.max(acc_ref[...], axis=1, keepdims=True)


def _row_max_pallas(flat):
    rows, cols = flat.shape
    dtype = flat.dtype
    itemsize = jnp.dtype(dtype).itemsize

    r_tile, l_tile = _pick_tiles(rows, cols, itemsize)
    n_chunks = l_tile // _LANE
    need_mask = (cols % l_tile) != 0
    minval = _min_value(dtype)

    grid = (_cdiv(rows, r_tile), _cdiv(cols, l_tile))

    in_block_bytes = r_tile * l_tile * itemsize
    acc_bytes = r_tile * _LANE * itemsize
    # 2x double-buffered input + scratch/out + headroom; stay well under v7x's
    # 64 MiB physical VMEM (v5e/v6e have 128 MiB, so this is safe everywhere).
    # TODO(synk): on v5e a 3-deep pipeline (pl.Buffered(3)) is free VMEM-wise but
    # marginal; skipped to keep one generation-agnostic configuration.
    vmem_limit = int(min(max(3 * in_block_bytes + 4 * acc_bytes + (2 << 20),
                             8 << 20), 32 << 20))

    kernel = functools.partial(
        _global_max_kernel, n_chunks=n_chunks, l_tile=l_tile, cols=cols,
        need_mask=need_mask, minval=minval)

    return pl.pallas_call(
        kernel,
        out_shape=jax.ShapeDtypeStruct((rows, 1), dtype),
        grid_spec=pltpu.PrefetchScalarGridSpec(
            num_scalar_prefetch=0,
            grid=grid,                                       # reduction axis last
            in_specs=[pl.BlockSpec((r_tile, l_tile), lambda r, l: (r, l))],
            out_specs=pl.BlockSpec((r_tile, 1), lambda r, l: (r, 0)),
            scratch_shapes=[pltpu.VMEM((r_tile, _LANE), dtype)],
        ),
        compiler_params=pltpu.CompilerParams(
            dimension_semantics=("parallel", "arbitrary"),
            vmem_limit_bytes=vmem_limit,
        ),
        cost_estimate=pl.CostEstimate(
            flops=rows * cols, transcendentals=0,
            bytes_accessed=rows * cols * itemsize + rows * itemsize),
    )(flat)


def global_max_pool2d(x, dim=(2, 3), keepdim=False, *, force_pallas=False):
    """Matches torch: x.amax(dim=dim, keepdim=keepdim)."""
    if isinstance(dim, int):
        dim = (dim,)
    ndim = x.ndim
    dims = tuple(sorted(d % ndim for d in dim))
    kept = tuple(d for d in range(ndim) if d not in dims)
    orig_shape = x.shape

    # Default dim=(2, 3) on (B, C, H, W): reduced axes already trailing -> no transpose.
    trailing = tuple(range(ndim - len(dims), ndim))
    if dims != trailing:
        # TODO(synk): non-trailing reduce dims fall back to one XLA transpose.
        x = jnp.transpose(x, kept + dims)

    kept_shape = tuple(orig_shape[d] for d in kept)
    red_shape = tuple(orig_shape[d] for d in dims)
    rows = max(1, math.prod(kept_shape))
    cols = max(1, math.prod(red_shape))

    flat = x.reshape(rows, cols)                   # free: contiguous reshape

    itemsize = jnp.dtype(x.dtype).itemsize
    supported = (jnp.issubdtype(x.dtype, jnp.floating)
                 or jnp.issubdtype(x.dtype, jnp.integer))
    small = rows * cols * itemsize < _MIN_PALLAS_BYTES
    if not supported or (small and not force_pallas):
        out = jnp.max(flat, axis=1, keepdims=True)   # tiny-tensor / odd-dtype fallback
    else:
        out = _row_max_pallas(flat)                  # (rows, 1)

    if keepdim:
        out_shape = tuple(1 if d in dims else orig_shape[d] for d in range(ndim))
    else:
        out_shape = kept_shape
    return out.reshape(out_shape)


if __name__ == "__main__":
    key = jax.random.PRNGKey(0)
    k1, k2, k3, k4 = jax.random.split(key, 4)

    # 1) Default module config, small shape (fallback path).
    B, C, H, W = 2, 4, 16, 16
    x = jax.random.normal(k1, (B, C, H, W), dtype=jnp.float32)
    y = jax.block_until_ready(global_max_pool2d(x, dim=(2, 3), keepdim=False))
    y_ref = jnp.max(x, axis=(2, 3))
    assert y.shape == (B, C)
    assert jnp.allclose(y, y_ref)

    y2 = jax.block_until_ready(global_max_pool2d(x, dim=(2, 3), keepdim=True))
    assert y2.shape == (B, C, 1, 1)
    assert jnp.allclose(y2[:, :, 0, 0], y_ref)

    # 2) Pallas path, ragged rows (B*C=15) and ragged cols (17*23=391): exercises
    #    in-kernel lane masking and out-of-bounds row handling.
    xr = jax.random.normal(k2, (3, 5, 17, 23), dtype=jnp.float32)
    yr = jax.block_until_ready(global_max_pool2d(xr, force_pallas=True))
    assert yr.shape == (3, 5)
    assert jnp.allclose(yr, jnp.max(xr, axis=(2, 3)))

    # 3) Pallas path, bf16 (dtype-aware sublane base = 16).
    xb = jax.random.normal(k3, (2, 16, 32, 40), dtype=jnp.bfloat16)
    yb = jax.block_until_ready(global_max_pool2d(xb, force_pallas=True))
    assert yb.shape == (2, 16)
    assert jnp.array_equal(yb, jnp.max(xb, axis=(2, 3)))

    # 4) Naturally Pallas-sized input (8 MiB): multi-block grid, split rows axis.
    xl = jax.random.normal(k4, (2, 64, 128, 128), dtype=jnp.float32)
    yl = jax.block_until_ready(global_max_pool2d(xl))
    assert yl.shape == (2, 64)
    assert jnp.allclose(yl, jnp.max(xl, axis=(2, 3)))

    print("KERNEL_OK")
</pallas_src>

<mosaic_0001>
module attributes {stable_mosaic.version = 11 : i64} {
  func.func @_global_max_kernel(%arg0: i32, %arg1: i32, %arg2: memref<16x512xf32, #tpu.memory_space<vmem>>, %arg3: memref<16x1xf32, #tpu.memory_space<vmem>>, %arg4: memref<16x128xf32, #tpu.memory_space<vmem>>) attributes {dimension_semantics = [#tpu.dimension_semantics<parallel>, #tpu.dimension_semantics<arbitrary>], iteration_bounds = array<i64: 1, 1>, scalar_prefetch = 0 : i64, scratch_operands = 1 : i64, tpu.core_type = #tpu.core_type<tc>, window_params = [{transform_indices = @transform_0, window_bounds = array<i64: 16, 512>}, {transform_indices = @transform_1, window_bounds = array<i64: 16, 1>}]} {
    %0 = tpu.iota {dimensions = array<i32: 1>} : vector<16x128xi32>
    %c512_i32 = arith.constant 512 : i32
    %1 = arith.muli %arg1, %c512_i32 : i32
    %c0 = arith.constant 0 : index
    %c0_0 = arith.constant 0 : index
    %2 = vector.load %arg2[%c0, %c0_0] : memref<16x512xf32, #tpu.memory_space<vmem>>, vector<16x128xf32>
    %c0_i32 = arith.constant 0 : i32
    %3 = arith.addi %1, %c0_i32 : i32
    %4 = vector.broadcast %3 : i32 to vector<16x128xi32>
    %5 = arith.addi %4, %0 : vector<16x128xi32>
    %c391_i32 = arith.constant 391 : i32
    %6 = vector.broadcast %c391_i32 : i32 to vector<16x128xi32>
    %7 = arith.cmpi slt, %5, %6 : vector<16x128xi32>
    %cst = arith.constant 0xFF800000 : f32
    %8 = vector.broadcast %cst : f32 to vector<16x128xf32>
    %9 = arith.select %7, %2, %8 : vector<16x128xi1>, vector<16x128xf32>
    %c0_1 = arith.constant 0 : index
    %c128 = arith.constant 128 : index
    %10 = vector.load %arg2[%c0_1, %c128] : memref<16x512xf32, #tpu.memory_space<vmem>>, vector<16x128xf32>
    %c128_i32 = arith.constant 128 : i32
    %11 = arith.addi %1, %c128_i32 : i32
    %12 = vector.broadcast %11 : i32 to vector<16x128xi32>
    %13 = arith.addi %12, %0 : vector<16x128xi32>
    %c391_i32_2 = arith.constant 391 : i32
    %14 = vector.broadcast %c391_i32_2 : i32 to vector<16x128xi32>
    %15 = arith.cmpi slt, %13, %14 : vector<16x128xi32>
    %cst_3 = arith.constant 0xFF800000 : f32
    %16 = vector.broadcast %cst_3 : f32 to vector<16x128xf32>
    %17 = arith.select %15, %10, %16 : vector<16x128xi1>, vector<16x128xf32>
    %18 = arith.maximumf %9, %17 : vector<16x128xf32>
    %c0_4 = arith.constant 0 : index
    %c256 = arith.constant 256 : index
    %19 = vector.load %arg2[%c0_4, %c256] : memref<16x512xf32, #tpu.memory_space<vmem>>, vector<16x128xf32>
    %c256_i32 = arith.constant 256 : i32
    %20 = arith.addi %1, %c256_i32 : i32
    %21 = vector.broadcast %20 : i32 to vector<16x128xi32>
    %22 = arith.addi %21, %0 : vector<16x128xi32>
    %c391_i32_5 = arith.constant 391 : i32
    %23 = vector.broadcast %c391_i32_5 : i32 to vector<16x128xi32>
    %24 = arith.cmpi slt, %22, %23 : vector<16x128xi32>
    %cst_6 = arith.constant 0xFF800000 : f32
    %25 = vector.broadcast %cst_6 : f32 to vector<16x128xf32>
    %26 = arith.select %24, %19, %25 : vector<16x128xi1>, vector<16x128xf32>
    %27 = arith.maximumf %18, %26 : vector<16x128xf32>
    %c0_7 = arith.constant 0 : index
    %c384 = arith.constant 384 : index
    %28 = vector.load %arg2[%c0_7, %c384] : memref<16x512xf32, #tpu.memory_space<vmem>>, vector<16x128xf32>
    %c384_i32 = arith.constant 384 : i32
    %29 = arith.addi %1, %c384_i32 : i32
    %30 = vector.broadcast %29 : i32 to vector<16x128xi32>
    %31 = arith.addi %30, %0 : vector<16x128xi32>
    %c391_i32_8 = arith.constant 391 : i32
    %32 = vector.broadcast %c391_i32_8 : i32 to vector<16x128xi32>
    %33 = arith.cmpi slt, %31, %32 : vector<16x128xi32>
    %cst_9 = arith.constant 0xFF800000 : f32
    %34 = vector.broadcast %cst_9 : f32 to vector<16x128xf32>
    %35 = arith.select %33, %28, %34 : vector<16x128xi1>, vector<16x128xf32>
    %36 = arith.maximumf %27, %35 : vector<16x128xf32>
    %c0_i32_10 = arith.constant 0 : i32
    %37 = arith.cmpi eq, %arg1, %c0_i32_10 : i32
    %38 = arith.extui %37 : i1 to i32
    %c0_i32_11 = arith.constant 0 : i32
    %39 = arith.cmpi ne, %38, %c0_i32_11 : i32
    scf.if %39 {
      %c0_16 = arith.constant 0 : index
      %c0_17 = arith.constant 0 : index
      %46 = vector.load %arg4[%c0_16, %c0_17] : memref<16x128xf32, #tpu.memory_space<vmem>>, vector<16x128xf32>
      tpu.vector_store %arg4[%c0_16, %c0_17], %36 {strides = array<i32>} : memref<16x128xf32, #tpu.memory_space<vmem>>, vector<16x128xf32>,
    } else {
    }
    %c0_i32_12 = arith.constant 0 : i32
    %40 = arith.cmpi sgt, %arg1, %c0_i32_12 : i32
    %41 = arith.extui %40 : i1 to i32
    %c0_i32_13 = arith.constant 0 : i32
    %42 = arith.cmpi ne, %41, %c0_i32_13 : i32
    scf.if %42 {
      %c0_16 = arith.constant 0 : index
      %c0_17 = arith.constant 0 : index
      %46 = vector.load %arg4[%c0_16, %c0_17] : memref<16x128xf32, #tpu.memory_space<vmem>>, vector<16x128xf32>
      %47 = arith.maximumf %46, %36 : vector<16x128xf32>
      %c0_18 = arith.constant 0 : index
      %c0_19 = arith.constant 0 : index
      %48 = vector.load %arg4[%c0_18, %c0_19] : memref<16x128xf32, #tpu.memory_space<vmem>>, vector<16x128xf32>
      tpu.vector_store %arg4[%c0_18, %c0_19], %47 {strides = array<i32>} : memref<16x128xf32, #tpu.memory_space<vmem>>, vector<16x128xf32>,
    } else {
    }
    %c0_i32_14 = arith.constant 0 : i32
    %43 = arith.cmpi eq, %arg1, %c0_i32_14 : i32
    %44 = arith.extui %43 : i1 to i32
    %c0_i32_15 = arith.constant 0 : i32
    %45 = arith.cmpi ne, %44, %c0_i32_15 : i32
    scf.if %45 {
      %c0_16 = arith.constant 0 : index
      %c0_17 = arith.constant 0 : index
      %46 = vector.load %arg4[%c0_16, %c0_17] : memref<16x128xf32, #tpu.memory_space<vmem>>, vector<16x128xf32>
      %cst_18 = arith.constant dense<0xFF800000> : vector<16xf32>
      %47 = vector.multi_reduction <maximumf>, %46, %cst_18 [1] : vector<16x128xf32> to vector<16xf32>
      %48 = vector.shape_cast %47 : vector<16xf32> to vector<16x1xf32>
      %c0_19 = arith.constant 0 : index
      %c0_20 = arith.constant 0 : index
      %49 = vector.load %arg3[%c0_19, %c0_20] : memref<16x1xf32, #tpu.memory_space<vmem>>, vector<16x1xf32>
      tpu.vector_store %arg3[%c0_19, %c0_20], %48 {strides = array<i32>} : memref<16x1xf32, #tpu.memory_space<vmem>>, vector<16x1xf32>,
    } else {
    }
    return
  }
  func.func @transform_0(%arg0: i32, %arg1: i32) -> (i32, i32) {
    %c0_i32 = arith.constant 0 : i32
    return %arg0, %arg1 : i32, i32
  }
  func.func @transform_1(%arg0: i32, %arg1: i32) -> (i32, i32) {
    %c0_i32 = arith.constant 0 : i32
    %c0_i32_0 = arith.constant 0 : i32
    return %arg0, %c0_i32 : i32, i32
  }
}

</mosaic_0001>

<bundles_post_ra>
// kernel: tpu_custom_call.1
= control target key start
LH: loop header
LB: loop body
LE: loop exit
PB: predicated region body
PF: predicated region fallthrough
CT: control target
= control target key end

     0   :  { %6 = vsyncpa [#allocation4], 0  ;;  %s126_s9 = smov [#allocation3]   ;;  %s127_s11 = smov 512   ;;  %s150_s0 = inlined_call_operand.hbm [shape: f32[15,391], index: 0, kind: input, shape index: {}]   ;;  %s151_s1 = inlined_call_operand.vmem [shape: f32[15,1], index: 1, kind: output, shape index: {}]  }
   0x1   :  { %s11_s8 = sshll.u32 %s150_s0, 4  ;;  %s13_s10 = sshll.u32 %s126_s9, 4  ;;  %s12_s8 = int_to_ptr.hbm [resolvable:$true] %s11_s8  ;;  %s14_s10 = int_to_ptr.vmem [resolvable:$true] %s13_s10 }
   0x2   :  { %s128_s12 = smov 32  }
   0x3   :  { %19 = dma.hbm_to_vmem [thread:$0]  %s12_s8, 1024, %s14_s10, [#allocation4], %s127_s11, %s127_s11, %s128_s12  }
   0x4   :  { %124 = dma.done.wait [#allocation4], 1024  }
   0x5   :  { %125 = vsyncadd [#allocation4], 4294966272  ;;  %v24_v0 = vlaneseq  ;;  %v27_v3 = vld [vmem:[#allocation3] sm:$0xff]  ;;  %v34_v4 = vld [vmem:[#allocation3 + $0x8] sm:$0xff]  ;;  %vm89_vm1 = vcmask 7168  }
   0x6   :  { %v44_v5 = vld [vmem:[#allocation3 + $0x10] sm:$0xff]  ;;  %v42_v6 = vmax.f32 %v27_v3, %v34_v4  ;;  %v54_v7 = vld [vmem:[#allocation3 + $0x18] sm:$0xff]  ;;  %v28_v8 = vld [vmem:[#allocation3 + $0x20] sm:$0xff] }
   0x7   :  { %v25_v1 = vand.u32 127, %v24_v0  ;;  %v35_v9 = vld [vmem:[#allocation3 + $0x28] sm:$0xff]  ;;  %v45_v13 = vld [vmem:[#allocation3 + $0x30] sm:$0xff]  ;;  %v55_v15 = vld [vmem:[#allocation3 + $0x38] sm:$0xff] }
   0x8   :  { %v52_v11 = vmax.f32 %v42_v6, %v44_v5  ;;  %v43_v12 = vmax.f32 %v28_v8, %v35_v9 }
   0x9   :  { %v58_v2 = vadd.s32 384, %v25_v1 }
   0xa   :  { %v53_v16 = vmax.f32 %v43_v12, %v45_v13 }
   0xb   :  { %vm59_vm0 = vcmp.lt.s32.totalorder %v58_v2, 391 }
   0xc   :  { %v60_v10 = vsel %vm59_vm0, %v54_v7, -inf  ;;  %v61_v17 = vsel %vm59_vm0, %v55_v15, -inf }
   0xd   :  { %v62_v14 = vmax.f32 %v52_v11, %v60_v10  ;;  %v63_v18 = vmax.f32 %v53_v16, %v61_v17 }
   0xf   :  { %85 = vmax.xlane.f32.xlu0 %v62_v14 }
  0x17   :  { %87 = vmax.xlane.f32.xlu0 %v63_v18 }
  0x82   :  { %v86_v19 = vpop.xlane.xlu0 %85 }
  0x83   :  { %90 = vst.msk [vmem:[%s151_s1] sm:$0xff] %vm89_vm1, %v86_v19 }
  0x8a   :  { %v88_v20 = vpop.xlane.xlu0 %87 }
  0x8b   :  { %91 = vst.msk [vmem:[%s151_s1 + $0x8] sm:$0xff] %vm89_vm1, %v88_v20 }
  0x8c   :  { %96 = vsyncpa [#allocation4], 1 }

</bundles_post_ra>
